<compile_context>
chip_gen: v7x
topology: tpu7x:2x2x1
jax: 0.10.0
libtpu: 0.0.40
codegen_flags: <defaults>
</compile_context>

<pallas_src>
import functools
import math

import jax
import jax.numpy as jnp
from jax.experimental import pallas as pl
from jax.experimental.pallas import tpu as pltpu


def _im2col_kxm(x, kh, kw, stride, padding, dilation):
    """Plain-JAX glue: conv patches as a (K, M) matrix.

    Rows K are ordered (cin, kh, kw) to match the (OutC, Cin, KH, KW) weight
    flattening; columns M are ordered (n, oh, ow) (batch-major).
    """
    N, C, H, W = x.shape
    xp = jnp.pad(x, ((0, 0), (0, 0), (padding, padding), (padding, padding)))
    OH = (H + 2 * padding - dilation * (kh - 1) - 1) // stride + 1
    OW = (W + 2 * padding - dilation * (kw - 1) - 1) // stride + 1
    cols = []
    for i in range(kh):
        for j in range(kw):
            r0, c0 = i * dilation, j * dilation
            cols.append(xp[:, :,
                           r0:r0 + stride * (OH - 1) + 1:stride,
                           c0:c0 + stride * (OW - 1) + 1:stride])  # (N,C,OH,OW)
    col = jnp.stack(cols, axis=2)            # (N, C, KH*KW, OH, OW)
    col = col.transpose(1, 2, 0, 3, 4)       # (C, KH*KW, N, OH, OW)
    return col.reshape(C * kh * kw, N * OH * OW), OH, OW


def _pick_tile(total, align, target):
    """Largest multiple of `align` that divides `total` and is <= `target`.
    Falls back to `total` itself (a full-extent block is always legal)."""
    best = total
    for cand in range(align, min(target, total) + 1, align):
        if total % cand == 0:
            best = cand
    return best


def _make_pass1_kernel(sec_bias):
    """Fused conv matmuls + one-pass per-channel sum / sum-of-squares."""
    def kernel(p_ref, wcat_ref, bcat_ref, wsq_ref, bsq_ref, mask_ref,
               t_ref, sum_ref, sq_ref):
        p_bf = p_ref[...]                                      # (K, tm) bf16
        # Both convolutions in one widened MXU matmul (channels stacked on rows).
        y = jnp.dot(wcat_ref[...], p_bf,
                    preferred_element_type=jnp.float32) + bcat_ref[...]
        # ReSqU second-moment conv (wr^2) @ (p^2); kept f32 because s = z - v
        # is a difference of correlated terms.
        p32 = p_bf.astype(jnp.float32)
        v = jnp.dot(wsq_ref[...], p32 * p32,
                    preferred_element_type=jnp.float32) + bsq_ref[...]
        # Rows [0, c_relu) carry conv(x); rows [c_relu, c_cat) carry
        # s = convr(x)^2 - conv(x^2; wr^2, br^2) + secondary_bias.
        is_relu = mask_ref[...] > 0.5                          # (c_cat, 1)
        t = jnp.where(is_relu, y, y * y - v + sec_bias)
        t_ref[...] = t

        # BatchNorm batch statistics, accumulated across the "arbitrary" M axis
        # into resident output blocks (finalized to mean / rsqrt(var+eps) outside).
        @pl.when(pl.program_id(0) == 0)
        def _init():
            sum_ref[...] = jnp.zeros_like(sum_ref)
            sq_ref[...] = jnp.zeros_like(sq_ref)

        sum_ref[...] += jnp.sum(t, axis=1, keepdims=True)
        sq_ref[...] += jnp.sum(t * t, axis=1, keepdims=True)
    return kernel


def _make_pass2_kernel(neg_slope):
    """BatchNorm normalize / BatchBound / leaky_relu on (C, N, S) tiles."""
    def kernel(t_ref, mu_ref, inv_ref, mask_ref, o_ref):
        d = t_ref[...] - mu_ref[...]                           # (c_cat, N, ts)
        is_relu = mask_ref[...] > 0.5                          # (c_cat, 1, 1)
        # BatchBound: divide by max(|.|) over the batch axis.  The BN scale
        # rsqrt(var+eps) cancels in n2 / max|n2|, so only the mean subtraction
        # matters for the ReSqU rows.  (A zero batch-max yields NaN exactly
        # like the PyTorch reference.)
        gmax = jnp.max(jnp.abs(d), axis=1, keepdims=True)      # (c_cat, 1, ts)
        bounded = d / gmax
        normed = d * inv_ref[...]
        out = jnp.where(is_relu, normed, bounded)
        o_ref[...] = jnp.where(out >= 0, out, neg_slope * out)
    return kernel


@functools.partial(
    jax.jit,
    static_argnames=("stride", "padding", "dilation", "m_tile", "s_tile",
                     "eps", "neg_slope", "secondary_bias"))
def split_resqu_conv(x_nchw, w_conv, b_conv, w_convr, b_convr, *,
                     stride=1, padding=0, dilation=1,
                     m_tile=None, s_tile=None,
                     eps=1e-5, neg_slope=0.02, secondary_bias=0.0):
    """Forward of SplitReSqUConv (groups=1, bias=True, resqu_bias=True,
    secondary_bias=False, norm=True, bound_resqu=True) on NCHW input."""
    N, Cin, H, W = x_nchw.shape
    c_relu = w_conv.shape[0]
    c_resqu = w_convr.shape[0]
    c_cat = c_relu + c_resqu
    KH, KW = w_conv.shape[2], w_conv.shape[3]
    K = Cin * KH * KW

    # ---- host-side glue: im2col, stored bf16 to halve the dominant HBM stream.
    # TODO(synk): fuse patch extraction into pass 1 (windowed BlockSpecs over
    # the padded NCHW input) to remove the KH*KW x HBM inflation.
    patches, OH, OW = _im2col_kxm(x_nchw.astype(jnp.float32),
                                  KH, KW, stride, padding, dilation)
    patches = patches.astype(jnp.bfloat16)                   # (K, M)
    S = OH * OW
    M = N * S

    # Fused weights: one MXU matmul yields both branches (rows = channels).
    w_cat = jnp.concatenate(
        [w_conv.reshape(c_relu, K), w_convr.reshape(c_resqu, K)],
        axis=0).astype(jnp.bfloat16)                          # (c_cat, K)
    b_cat = jnp.concatenate([b_conv, b_convr]).reshape(c_cat, 1).astype(jnp.float32)
    # Squared ReSqU weights/bias hoisted out of the kernel.  Built from the
    # bf16-rounded weights so z and v see identical quantization; rows for the
    # ReLU branch are zero (they are masked off in-kernel anyway).
    wr_q = w_convr.reshape(c_resqu, K).astype(jnp.bfloat16).astype(jnp.float32)
    w_sq = jnp.concatenate(
        [jnp.zeros((c_relu, K), jnp.float32), wr_q * wr_q], axis=0)
    b_sq = jnp.concatenate(
        [jnp.zeros((c_relu,), jnp.float32),
         (b_convr * b_convr).astype(jnp.float32)]).reshape(c_cat, 1)
    relu_mask = (jnp.arange(c_cat) < c_relu).astype(jnp.float32)

    if m_tile is None:
        m_tile = _pick_tile(M, 128, 2048)
    if s_tile is None:
        s_tile = _pick_tile(S, 128, 2048)
    assert M % m_tile == 0 and S % s_tile == 0

    # ---------------- pass 1: matmuls + statistics ----------------
    t_mat, t_sum, t_sq = pl.pallas_call(
        _make_pass1_kernel(secondary_bias),
        grid=(M // m_tile,),
        in_specs=[
            pl.BlockSpec((K, m_tile), lambda i: (0, i)),        # P^T tile
            pl.BlockSpec((c_cat, K), lambda i: (0, 0)),         # W_cat
            pl.BlockSpec((c_cat, 1), lambda i: (0, 0)),         # b_cat
            pl.BlockSpec((c_cat, K), lambda i: (0, 0)),         # Wr^2 (zero-padded)
            pl.BlockSpec((c_cat, 1), lambda i: (0, 0)),         # br^2 (zero-padded)
            pl.BlockSpec((c_cat, 1), lambda i: (0, 0)),         # relu-row mask
        ],
        out_specs=[
            pl.BlockSpec((c_cat, m_tile), lambda i: (0, i)),    # t = [conv ; s]
            pl.BlockSpec((c_cat, 1), lambda i: (0, 0)),         # sum   (resident)
            pl.BlockSpec((c_cat, 1), lambda i: (0, 0)),         # sumsq (resident)
        ],
        out_shape=[
            jax.ShapeDtypeStruct((c_cat, M), jnp.float32),
            jax.ShapeDtypeStruct((c_cat, 1), jnp.float32),
            jax.ShapeDtypeStruct((c_cat, 1), jnp.float32),
        ],
        compiler_params=pltpu.CompilerParams(
            # stats accumulate across this axis -> must stay sequential
            dimension_semantics=("arbitrary",),
            # per-step working set is a few MiB at the default tiles; 32 MiB
            # leaves headroom on v5e/v6e (128 MiB) and on v7x (64 MiB physical).
            vmem_limit_bytes=32 * 1024 * 1024),
    )(patches, w_cat, b_cat, w_sq, b_sq, relu_mask.reshape(c_cat, 1))

    # Tiny per-channel finalize (O(c_cat) scalars, XLA glue).
    mu = t_sum / float(M)                                    # (c_cat, 1)
    var = jnp.maximum(t_sq / float(M) - mu * mu, 0.0)        # biased batch var
    inv_std = jax.lax.rsqrt(var + eps)                       # ReLU rows only

    # ---------------- pass 2: normalize / bound / activation ----------------
    t3 = t_mat.reshape(c_cat, N, S)          # columns were (n, oh, ow)-ordered
    out3 = pl.pallas_call(
        _make_pass2_kernel(neg_slope),
        grid=(S // s_tile,),
        in_specs=[
            pl.BlockSpec((c_cat, N, s_tile), lambda j: (0, 0, j)),
            pl.BlockSpec((c_cat, 1, 1), lambda j: (0, 0, 0)),   # mean
            pl.BlockSpec((c_cat, 1, 1), lambda j: (0, 0, 0)),   # rsqrt(var+eps)
            pl.BlockSpec((c_cat, 1, 1), lambda j: (0, 0, 0)),   # relu-row mask
        ],
        out_specs=pl.BlockSpec((c_cat, N, s_tile), lambda j: (0, 0, j)),
        out_shape=jax.ShapeDtypeStruct((c_cat, N, S), jnp.float32),
        compiler_params=pltpu.CompilerParams(
            # independent spatial tiles -> shard across v7x's two TensorCores
            dimension_semantics=("parallel",),
            vmem_limit_bytes=32 * 1024 * 1024),
    )(t3, mu.reshape(c_cat, 1, 1), inv_std.reshape(c_cat, 1, 1),
      relu_mask.reshape(c_cat, 1, 1))

    # back to PyTorch NCHW (channel order [relu, resqu], as in the module)
    return out3.reshape(c_cat, N, OH, OW).transpose(1, 0, 2, 3)


def _reference_forward(x, w_conv, b_conv, w_convr, b_convr, *,
                       stride=1, padding=0, dilation=1,
                       eps=1e-5, neg_slope=0.02, secondary_bias=0.0):
    """Faithful pure-JAX translation of the PyTorch module forward (check only)."""
    dn = ("NCHW", "OIHW", "NCHW")

    def conv(inp, w, b):
        out = jax.lax.conv_general_dilated(
            inp, w, window_strides=(stride, stride),
            padding=((padding, padding), (padding, padding)),
            rhs_dilation=(dilation, dilation), dimension_numbers=dn,
            precision=jax.lax.Precision.HIGHEST)
        return out + b.reshape(1, -1, 1, 1)

    y1 = conv(x, w_conv, b_conv)
    z = conv(x, w_convr, b_convr) ** 2
    v = conv(x * x, w_convr * w_convr, b_convr * b_convr)
    s = z - v + secondary_bias

    def bn(a):
        mu = jnp.mean(a, axis=(0, 2, 3), keepdims=True)
        var = jnp.mean((a - mu) ** 2, axis=(0, 2, 3), keepdims=True)
        return (a - mu) * jax.lax.rsqrt(var + eps)

    n1 = bn(y1)
    n2 = bn(s)
    bounded = n2 / jnp.max(jnp.abs(n2), axis=0, keepdims=True)
    oc = jnp.concatenate([n1, bounded], axis=1)
    return jnp.where(oc >= 0, oc, neg_slope * oc)


def _init_params(key, in_channels, relu_channels, resqu_channels, k):
    """Deterministic synthetic init mirroring the module's __init__ scales."""
    k1, k2, k3, k4 = jax.random.split(key, 4)
    fan_in = in_channels * k * k
    # conv: PyTorch default Conv2d init -> bound 1/sqrt(fan_in)
    bnd = 1.0 / math.sqrt(fan_in)
    w_conv = jax.random.uniform(k1, (relu_channels, in_channels, k, k),
                                jnp.float32, -bnd, bnd)
    b_conv = jax.random.uniform(k2, (relu_channels,), jnp.float32, -bnd, bnd)
    # convr: xavier_uniform with gain 0.2
    fan_out = resqu_channels * k * k
    xbnd = 0.2 * math.sqrt(6.0 / (fan_in + fan_out))
    w_convr = jax.random.uniform(k3, (resqu_channels, in_channels, k, k),
                                 jnp.float32, -xbnd, xbnd)
    b_convr = jax.random.uniform(k4, (resqu_channels,), jnp.float32, -bnd, bnd)
    return w_conv, b_conv, w_convr, b_convr


if __name__ == "__main__":
    key = jax.random.PRNGKey(0)
    kx, kp = jax.random.split(key)

    N, Cin, H, W = 2, 4, 16, 16
    relu_channels, resqu_channels, ksize = 4, 4, 3

    x = jax.random.normal(kx, (N, Cin, H, W), jnp.float32)
    w_conv, b_conv, w_convr, b_convr = _init_params(
        kp, Cin, relu_channels, resqu_channels, ksize)

    # Small tiles so the demo shapes (M = 512, S = 256) exercise multi-step
    # grids / software pipelining; real sizes can rely on the _pick_tile defaults.
    out = split_resqu_conv(x, w_conv, b_conv, w_convr, b_convr,
                           stride=1, padding=1, dilation=1,
                           m_tile=128, s_tile=128)
    out = jax.block_until_ready(out)
    assert out.shape == (N, relu_channels + resqu_channels, H, W)
    assert bool(jnp.all(jnp.isfinite(out)))

    # Correctness: faithful module forward evaluated on the same bf16-rounded
    # x / conv weights that the kernel pipeline consumes (biases stay f32).
    xq = x.astype(jnp.bfloat16).astype(jnp.float32)
    wq = w_conv.astype(jnp.bfloat16).astype(jnp.float32)
    wrq = w_convr.astype(jnp.bfloat16).astype(jnp.float32)
    ref = _reference_forward(xq, wq, b_conv, wrq, b_convr,
                             stride=1, padding=1, dilation=1)
    max_err = float(jnp.max(jnp.abs(out - ref)))
    assert max_err < 5e-3, f"max abs error vs reference: {max_err}"

    print("KERNEL_OK")
</pallas_src>

<mosaic_0001>
module attributes {stable_mosaic.version = 11 : i64} {
  func.func @kernel(%arg0: i32, %arg1: memref<36x128xbf16, #tpu.memory_space<vmem>>, %arg2: memref<8x36xbf16, #tpu.memory_space<vmem>>, %arg3: memref<8x1xf32, #tpu.memory_space<vmem>>, %arg4: memref<8x36xf32, #tpu.memory_space<vmem>>, %arg5: memref<8x1xf32, #tpu.memory_space<vmem>>, %arg6: memref<8x1xf32, #tpu.memory_space<vmem>>, %arg7: memref<8x128xf32, #tpu.memory_space<vmem>>, %arg8: memref<8x1xf32, #tpu.memory_space<vmem>>, %arg9: memref<8x1xf32, #tpu.memory_space<vmem>>) attributes {dimension_semantics = [#tpu.dimension_semantics<arbitrary>], iteration_bounds = array<i64: 4>, scalar_prefetch = 0 : i64, scratch_operands = 0 : i64, tpu.core_type = #tpu.core_type<tc>, window_params = [{transform_indices = @transform_0, window_bounds = array<i64: 36, 128>}, {pipeline_mode = #tpu.pipeline_mode<synchronous>, transform_indices = @transform_1, window_bounds = array<i64: 8, 36>}, {pipeline_mode = #tpu.pipeline_mode<synchronous>, transform_indices = @transform_2, window_bounds = array<i64: 8, 1>}, {pipeline_mode = #tpu.pipeline_mode<synchronous>, transform_indices = @transform_3, window_bounds = array<i64: 8, 36>}, {pipeline_mode = #tpu.pipeline_mode<synchronous>, transform_indices = @transform_4, window_bounds = array<i64: 8, 1>}, {pipeline_mode = #tpu.pipeline_mode<synchronous>, transform_indices = @transform_5, window_bounds = array<i64: 8, 1>}, {transform_indices = @transform_6, window_bounds = array<i64: 8, 128>}, {pipeline_mode = #tpu.pipeline_mode<synchronous>, transform_indices = @transform_7, window_bounds = array<i64: 8, 1>}, {pipeline_mode = #tpu.pipeline_mode<synchronous>, transform_indices = @transform_8, window_bounds = array<i64: 8, 1>}]} {
    %c0 = arith.constant 0 : index
    %c0_0 = arith.constant 0 : index
    %0 = vector.load %arg1[%c0, %c0_0] : memref<36x128xbf16, #tpu.memory_space<vmem>>, vector<36x128xbf16>
    %c0_1 = arith.constant 0 : index
    %c0_2 = arith.constant 0 : index
    %1 = vector.load %arg2[%c0_1, %c0_2] : memref<8x36xbf16, #tpu.memory_space<vmem>>, vector<8x36xbf16>
    %cst = arith.constant dense<0.000000e+00> : vector<8x128xf32>
    %2 = tpu.matmul %1, %0, %cst {dimension_numbers = #tpu.dot_dimension_numbers<[1], [0], [0], [1], [0, 0, 1, 1], [], []>} : vector<8x36xbf16>, vector<36x128xbf16>, vector<8x128xf32> -> vector<8x128xf32>
    %c0_3 = arith.constant 0 : index
    %c0_4 = arith.constant 0 : index
    %3 = vector.load %arg3[%c0_3, %c0_4] : memref<8x1xf32, #tpu.memory_space<vmem>>, vector<8x1xf32>
    %4 = vector.broadcast %3 : vector<8x1xf32> to vector<8x128xf32>
    %5 = arith.addf %2, %4 : vector<8x128xf32>
    %6 = arith.extf %0 : vector<36x128xbf16> to vector<36x128xf32>
    %c0_5 = arith.constant 0 : index
    %c0_6 = arith.constant 0 : index
    %7 = vector.load %arg4[%c0_5, %c0_6] : memref<8x36xf32, #tpu.memory_space<vmem>>, vector<8x36xf32>
    %8 = arith.mulf %6, %6 : vector<36x128xf32>
    %cst_7 = arith.constant dense<0.000000e+00> : vector<8x128xf32>
    %9 = tpu.matmul %7, %8, %cst_7 {dimension_numbers = #tpu.dot_dimension_numbers<[1], [0], [0], [1], [0, 0, 1, 1], [], []>} : vector<8x36xf32>, vector<36x128xf32>, vector<8x128xf32> -> vector<8x128xf32>
    %c0_8 = arith.constant 0 : index
    %c0_9 = arith.constant 0 : index
    %10 = vector.load %arg5[%c0_8, %c0_9] : memref<8x1xf32, #tpu.memory_space<vmem>>, vector<8x1xf32>
    %11 = vector.broadcast %10 : vector<8x1xf32> to vector<8x128xf32>
    %12 = arith.addf %9, %11 : vector<8x128xf32>
    %c0_10 = arith.constant 0 : index
    %c0_11 = arith.constant 0 : index
    %13 = vector.load %arg6[%c0_10, %c0_11] : memref<8x1xf32, #tpu.memory_space<vmem>>, vector<8x1xf32>
    %cst_12 = arith.constant 5.000000e-01 : f32
    %14 = vector.broadcast %cst_12 : f32 to vector<8x1xf32>
    %15 = arith.cmpf ogt, %13, %14 : vector<8x1xf32>
    %16 = arith.mulf %5, %5 : vector<8x128xf32>
    %17 = arith.subf %16, %12 : vector<8x128xf32>
    %cst_13 = arith.constant 0.000000e+00 : f32
    %18 = vector.broadcast %cst_13 : f32 to vector<8x128xf32>
    %19 = arith.addf %17, %18 : vector<8x128xf32>
    %20 = vector.shape_cast %15 : vector<8x1xi1> to vector<8x1xi1>
    %21 = vector.broadcast %20 : vector<8x1xi1> to vector<8x128xi1>
    %22 = arith.select %21, %5, %19 : vector<8x128xi1>, vector<8x128xf32>
    %c0_14 = arith.constant 0 : index
    %c0_15 = arith.constant 0 : index
    %23 = vector.load %arg7[%c0_14, %c0_15] : memref<8x128xf32, #tpu.memory_space<vmem>>, vector<8x128xf32>
    tpu.vector_store %arg7[%c0_14, %c0_15], %22 {strides = array<i32>} : memref<8x128xf32, #tpu.memory_space<vmem>>, vector<8x128xf32>,
    %c0_i32 = arith.constant 0 : i32
    %24 = arith.cmpi eq, %arg0, %c0_i32 : i32
    %25 = arith.extui %24 : i1 to i32
    %c0_i32_16 = arith.constant 0 : i32
    %26 = arith.cmpi ne, %25, %c0_i32_16 : i32
    scf.if %26 {
      %cst_27 = arith.constant 0.000000e+00 : f32
      %38 = vector.broadcast %cst_27 : f32 to vector<8x1xf32>
      %c0_28 = arith.constant 0 : index
      %c0_29 = arith.constant 0 : index
      %39 = vector.load %arg8[%c0_28, %c0_29] : memref<8x1xf32, #tpu.memory_space<vmem>>, vector<8x1xf32>
      tpu.vector_store %arg8[%c0_28, %c0_29], %38 {strides = array<i32>} : memref<8x1xf32, #tpu.memory_space<vmem>>, vector<8x1xf32>,
      %cst_30 = arith.constant 0.000000e+00 : f32
      %40 = vector.broadcast %cst_30 : f32 to vector<8x1xf32>
      %c0_31 = arith.constant 0 : index
      %c0_32 = arith.constant 0 : index
      %41 = vector.load %arg9[%c0_31, %c0_32] : memref<8x1xf32, #tpu.memory_space<vmem>>, vector<8x1xf32>
      tpu.vector_store %arg9[%c0_31, %c0_32], %40 {strides = array<i32>} : memref<8x1xf32, #tpu.memory_space<vmem>>, vector<8x1xf32>,
    } else {
    }
    %c0_17 = arith.constant 0 : index
    %c0_18 = arith.constant 0 : index
    %27 = vector.load %arg8[%c0_17, %c0_18] : memref<8x1xf32, #tpu.memory_space<vmem>>, vector<8x1xf32>
    %cst_19 = arith.constant dense<0.000000e+00> : vector<8xf32>
    %28 = vector.multi_reduction <add>, %22, %cst_19 [1] : vector<8x128xf32> to vector<8xf32>
    %29 = vector.shape_cast %28 : vector<8xf32> to vector<8x1xf32>
    %30 = arith.addf %27, %29 : vector<8x1xf32>
    %c0_20 = arith.constant 0 : index
    %c0_21 = arith.constant 0 : index
    %31 = vector.load %arg8[%c0_20, %c0_21] : memref<8x1xf32, #tpu.memory_space<vmem>>, vector<8x1xf32>
    tpu.vector_store %arg8[%c0_20, %c0_21], %30 {strides = array<i32>} : memref<8x1xf32, #tpu.memory_space<vmem>>, vector<8x1xf32>,
    %c0_22 = arith.constant 0 : index
    %c0_23 = arith.constant 0 : index
    %32 = vector.load %arg9[%c0_22, %c0_23] : memref<8x1xf32, #tpu.memory_space<vmem>>, vector<8x1xf32>
    %33 = arith.mulf %22, %22 : vector<8x128xf32>
    %cst_24 = arith.constant dense<0.000000e+00> : vector<8xf32>
    %34 = vector.multi_reduction <add>, %33, %cst_24 [1] : vector<8x128xf32> to vector<8xf32>
    %35 = vector.shape_cast %34 : vector<8xf32> to vector<8x1xf32>
    %36 = arith.addf %32, %35 : vector<8x1xf32>
    %c0_25 = arith.constant 0 : index
    %c0_26 = arith.constant 0 : index
    %37 = vector.load %arg9[%c0_25, %c0_26] : memref<8x1xf32, #tpu.memory_space<vmem>>, vector<8x1xf32>
    tpu.vector_store %arg9[%c0_25, %c0_26], %36 {strides = array<i32>} : memref<8x1xf32, #tpu.memory_space<vmem>>, vector<8x1xf32>,
    return
  }
  func.func @transform_0(%arg0: i32) -> (i32, i32) {
    %c0_i32 = arith.constant 0 : i32
    %c0_i32_0 = arith.constant 0 : i32
    return %c0_i32, %arg0 : i32, i32
  }
  func.func @transform_1(%arg0: i32) -> (i32, i32) {
    %c0_i32 = arith.constant 0 : i32
    %c0_i32_0 = arith.constant 0 : i32
    %c0_i32_1 = arith.constant 0 : i32
    return %c0_i32, %c0_i32_0 : i32, i32
  }
  func.func @transform_2(%arg0: i32) -> (i32, i32) {
    %c0_i32 = arith.constant 0 : i32
    %c0_i32_0 = arith.constant 0 : i32
    %c0_i32_1 = arith.constant 0 : i32
    return %c0_i32, %c0_i32_0 : i32, i32
  }
  func.func @transform_3(%arg0: i32) -> (i32, i32) {
    %c0_i32 = arith.constant 0 : i32
    %c0_i32_0 = arith.constant 0 : i32
    %c0_i32_1 = arith.constant 0 : i32
    return %c0_i32, %c0_i32_0 : i32, i32
  }
  func.func @transform_4(%arg0: i32) -> (i32, i32) {
    %c0_i32 = arith.constant 0 : i32
    %c0_i32_0 = arith.constant 0 : i32
    %c0_i32_1 = arith.constant 0 : i32
    return %c0_i32, %c0_i32_0 : i32, i32
  }
  func.func @transform_5(%arg0: i32) -> (i32, i32) {
    %c0_i32 = arith.constant 0 : i32
    %c0_i32_0 = arith.constant 0 : i32
    %c0_i32_1 = arith.constant 0 : i32
    return %c0_i32, %c0_i32_0 : i32, i32
  }
  func.func @transform_6(%arg0: i32) -> (i32, i32) {
    %c0_i32 = arith.constant 0 : i32
    %c0_i32_0 = arith.constant 0 : i32
    return %c0_i32, %arg0 : i32, i32
  }
  func.func @transform_7(%arg0: i32) -> (i32, i32) {
    %c0_i32 = arith.constant 0 : i32
    %c0_i32_0 = arith.constant 0 : i32
    %c0_i32_1 = arith.constant 0 : i32
    return %c0_i32, %c0_i32_0 : i32, i32
  }
  func.func @transform_8(%arg0: i32) -> (i32, i32) {
    %c0_i32 = arith.constant 0 : i32
    %c0_i32_0 = arith.constant 0 : i32
    %c0_i32_1 = arith.constant 0 : i32
    return %c0_i32, %c0_i32_0 : i32, i32
  }
}

module attributes {stable_mosaic.version = 11 : i64} {
  func.func @kernel(%arg0: i32, %arg1: memref<8x2x128xf32, #tpu.memory_space<vmem>>, %arg2: memref<8x1x1xf32, #tpu.memory_space<vmem>>, %arg3: memref<8x1x1xf32, #tpu.memory_space<vmem>>, %arg4: memref<8x1x1xf32, #tpu.memory_space<vmem>>, %arg5: memref<8x2x128xf32, #tpu.memory_space<vmem>>) attributes {dimension_semantics = [#tpu.dimension_semantics<parallel>], iteration_bounds = array<i64: 2>, scalar_prefetch = 0 : i64, scratch_operands = 0 : i64, tpu.core_type = #tpu.core_type<tc>, window_params = [{transform_indices = @transform_0, window_bounds = array<i64: 8, 2, 128>}, {pipeline_mode = #tpu.pipeline_mode<synchronous>, transform_indices = @transform_1, window_bounds = array<i64: 8, 1, 1>}, {pipeline_mode = #tpu.pipeline_mode<synchronous>, transform_indices = @transform_2, window_bounds = array<i64: 8, 1, 1>}, {pipeline_mode = #tpu.pipeline_mode<synchronous>, transform_indices = @transform_3, window_bounds = array<i64: 8, 1, 1>}, {transform_indices = @transform_4, window_bounds = array<i64: 8, 2, 128>}]} {
    %c0 = arith.constant 0 : index
    %c0_0 = arith.constant 0 : index
    %c0_1 = arith.constant 0 : index
    %0 = vector.load %arg1[%c0, %c0_0, %c0_1] : memref<8x2x128xf32, #tpu.memory_space<vmem>>, vector<8x2x128xf32>
    %c0_2 = arith.constant 0 : index
    %c0_3 = arith.constant 0 : index
    %c0_4 = arith.constant 0 : index
    %1 = vector.load %arg2[%c0_2, %c0_3, %c0_4] : memref<8x1x1xf32, #tpu.memory_space<vmem>>, vector<8x1x1xf32>
    %2 = vector.broadcast %1 : vector<8x1x1xf32> to vector<8x2x128xf32>
    %3 = arith.subf %0, %2 : vector<8x2x128xf32>
    %c0_5 = arith.constant 0 : index
    %c0_6 = arith.constant 0 : index
    %c0_7 = arith.constant 0 : index
    %4 = vector.load %arg4[%c0_5, %c0_6, %c0_7] : memref<8x1x1xf32, #tpu.memory_space<vmem>>, vector<8x1x1xf32>
    %cst = arith.constant 5.000000e-01 : f32
    %5 = vector.broadcast %cst : f32 to vector<8x1x1xf32>
    %6 = arith.cmpf ogt, %4, %5 : vector<8x1x1xf32>
    %7 = math.absf %3 : vector<8x2x128xf32>
    %cst_8 = arith.constant dense<0xFF800000> : vector<8x128xf32>
    %8 = vector.multi_reduction <maximumf>, %7, %cst_8 [1] : vector<8x2x128xf32> to vector<8x128xf32>
    %9 = vector.shape_cast %8 : vector<8x128xf32> to vector<8x1x128xf32>
    %10 = vector.broadcast %9 : vector<8x1x128xf32> to vector<8x2x128xf32>
    %11 = arith.divf %3, %10 : vector<8x2x128xf32>
    %c0_9 = arith.constant 0 : index
    %c0_10 = arith.constant 0 : index
    %c0_11 = arith.constant 0 : index
    %12 = vector.load %arg3[%c0_9, %c0_10, %c0_11] : memref<8x1x1xf32, #tpu.memory_space<vmem>>, vector<8x1x1xf32>
    %13 = vector.broadcast %12 : vector<8x1x1xf32> to vector<8x2x128xf32>
    %14 = arith.mulf %3, %13 : vector<8x2x128xf32>
    %15 = vector.shape_cast %6 : vector<8x1x1xi1> to vector<8x1x1xi1>
    %16 = vector.broadcast %15 : vector<8x1x1xi1> to vector<8x2x128xi1>
    %17 = arith.select %16, %14, %11 : vector<8x2x128xi1>, vector<8x2x128xf32>
    %cst_12 = arith.constant 0.000000e+00 : f32
    %18 = vector.broadcast %cst_12 : f32 to vector<8x2x128xf32>
    %19 = arith.cmpf oge, %17, %18 : vector<8x2x128xf32>
    %cst_13 = arith.constant 2.000000e-02 : f32
    %20 = vector.broadcast %cst_13 : f32 to vector<8x2x128xf32>
    %21 = arith.mulf %20, %17 : vector<8x2x128xf32>
    %22 = arith.select %19, %17, %21 : vector<8x2x128xi1>, vector<8x2x128xf32>
    %c0_14 = arith.constant 0 : index
    %c0_15 = arith.constant 0 : index
    %c0_16 = arith.constant 0 : index
    %23 = vector.load %arg5[%c0_14, %c0_15, %c0_16] : memref<8x2x128xf32, #tpu.memory_space<vmem>>, vector<8x2x128xf32>
    tpu.vector_store %arg5[%c0_14, %c0_15, %c0_16], %22 {strides = array<i32>} : memref<8x2x128xf32, #tpu.memory_space<vmem>>, vector<8x2x128xf32>,
    return
  }
  func.func @transform_0(%arg0: i32) -> (i32, i32, i32) {
    %c0_i32 = arith.constant 0 : i32
    %c0_i32_0 = arith.constant 0 : i32
    %c0_i32_1 = arith.constant 0 : i32
    return %c0_i32, %c0_i32_0, %arg0 : i32, i32, i32
  }
  func.func @transform_1(%arg0: i32) -> (i32, i32, i32) {
    %c0_i32 = arith.constant 0 : i32
    %c0_i32_0 = arith.constant 0 : i32
    %c0_i32_1 = arith.constant 0 : i32
    %c0_i32_2 = arith.constant 0 : i32
    return %c0_i32, %c0_i32_0, %c0_i32_1 : i32, i32, i32
  }
  func.func @transform_2(%arg0: i32) -> (i32, i32, i32) {
    %c0_i32 = arith.constant 0 : i32
    %c0_i32_0 = arith.constant 0 : i32
    %c0_i32_1 = arith.constant 0 : i32
    %c0_i32_2 = arith.constant 0 : i32
    return %c0_i32, %c0_i32_0, %c0_i32_1 : i32, i32, i32
  }
  func.func @transform_3(%arg0: i32) -> (i32, i32, i32) {
    %c0_i32 = arith.constant 0 : i32
    %c0_i32_0 = arith.constant 0 : i32
    %c0_i32_1 = arith.constant 0 : i32
    %c0_i32_2 = arith.constant 0 : i32
    return %c0_i32, %c0_i32_0, %c0_i32_1 : i32, i32, i32
  }
  func.func @transform_4(%arg0: i32) -> (i32, i32, i32) {
    %c0_i32 = arith.constant 0 : i32
    %c0_i32_0 = arith.constant 0 : i32
    %c0_i32_1 = arith.constant 0 : i32
    return %c0_i32, %c0_i32_0, %arg0 : i32, i32, i32
  }
}

</mosaic_0001>

<bundles_post_ra>
// kernel: mul.4
= control target key start
LH: loop header
LB: loop body
LE: loop exit
PB: predicated region body
PF: predicated region fallthrough
CT: control target
= control target key end

     0   :  { %s34_s0 = inlined_call_operand.vmem [shape: f32[4], index: 0, kind: input, shape index: {}, may-alias: {0,1}]   ;;  %s35_s1 = inlined_call_operand.vmem [shape: f32[4], index: 1, kind: input, shape index: {}, may-alias: {0,1}]   ;;  %s36_s2 = inlined_call_operand.vmem [shape: f32[4], index: 2, kind: output, shape index: {}]  }
   0x1   :  { %v3_v0 = vld [vmem:[%s34_s0] sm:$0x1] }
   0x2   :  { %v4_v1 = vld [vmem:[%s35_s1] sm:$0x1] }
   0x3   :  { %v7_v2 = vmul.f32 %v4_v1, %v3_v0 }
   0x5   :  { %9 = vst [vmem:[%s36_s2] sm:$0x1] %v7_v2 }

// kernel: split_resqu_conv.2
= control target key start
LH: loop header
LB: loop body
LE: loop exit
PB: predicated region body
PF: predicated region fallthrough
CT: control target
= control target key end

     0   :  { %s795_s27 = smov 0   ;;  %s797_s28 = smov 0   ;;  %s883_s0 = inlined_call_operand.vmem [shape: bf16[36,512], index: 0, kind: input, shape index: {}]   ;;  %s884_s1 = inlined_call_operand.vmem [shape: bf16[8,36], index: 1, kind: input, shape index: {}]   ;;  %s885_s2 = inlined_call_operand.vmem [shape: f32[8,1], index: 2, kind: input, shape index: {}]   ;;  %s886_s3 = inlined_call_operand.vmem [shape: f32[8,36], index: 3, kind: input, shape index: {}]   ;;  %s887_s4 = inlined_call_operand.vmem [shape: f32[8,1], index: 4, kind: input, shape index: {}]   ;;  %s888_s5 = inlined_call_operand.vmem [shape: f32[8,1], index: 5, kind: input, shape index: {}]   ;;  %s889_s6 = inlined_call_operand.vmem [shape: f32[8,512], index: 6, kind: output, shape index: {0}]   ;;  %s890_s7 = inlined_call_operand.vmem [shape: f32[8,1], index: 7, kind: output, shape index: {1}]   ;;  %s891_s8 = inlined_call_operand.vmem [shape: f32[8,1], index: 8, kind: output, shape index: {2}]  }
   0x1   :  { %s799_s29 = smov 0  }
   0x2 LB: > { %s811_s30 = sadd.s32 4294967295, %s743_s29   ;;  %s814_s9 = sadd.s32 1, %s743_s29   ;;  %s743_s29 = sphi %s799_s29, %s894_s29   ;;  %s739_s28 = sphi %s797_s28, %s893_s28   ;;  %s735_s27 = sphi %s795_s27, %s892_s27  }
   0x3   : > { %s23_s10 = ssub.s32 %s743_s29, %s814_s9  ;;  %s26_s11 = sadd.s32 1, %s739_s28 }
   0x4   : > { %p24_p0 = scmp.eq.s32.totalorder %s23_s10, 0  ;;  %p33_p1 = scmp.ne.s32.totalorder %s739_s28, %s735_s27 }
   0x5   : > { %p34_p2 = scmp.eq.s32.totalorder %s743_s29, 0  ;;  %p631_p4 = scmp.ge.s32.totalorder %s743_s29, 4 }
   0x6   : > { %s823_s12 = scalar_select %p24_p0, %s739_s28, %s26_s11  }
   0x7   : > { %p35_p3 = por %p34_p2, %p33_p1  ;;  %247 = sbr.rel (%p631_p4) target bundleno = 21 (0x15), region = 36 }
   0xe   : > { %250 = sbr.rel (!%p35_p3) target bundleno = 21 (0x15), region = 40  ;;  %s252_s13 = sand.u32 (%p35_p3), 1, %s739_s28  }
   0xf   : > { %s632_s14 = sshll.u32 (%p35_p3), %s743_s29, 2  ;;  %s683_s15 = smul.u32 (%p35_p3), 20, %s252_s13 }
  0x10   : > { %s256_s18 = scalar_lea.vmem (%p35_p3), %s883_s0, %s632_s14 }
  0x11   : > { %v272_v0 = vld [vmem:[%s256_s18] sm:$0xf] (%p35_p3)  ;;  %v274_v1 = vld [vmem:[%s256_s18 + $0x10] sm:$0xf] (%p35_p3)  ;;  %s254_s19 = scalar_lea.vmem (%p35_p3), [#allocation2], %s683_s15 }
  0x12   : > { %v276_v2 = vld [vmem:[%s256_s18 + $0x20] sm:$0xf] (%p35_p3)  ;;  %v278_v3 = vld [vmem:[%s256_s18 + $0x30] sm:$0xf] (%p35_p3)  ;;  %273 = vst [vmem:[%s254_s19] sm:$0xf] (%p35_p3), %v272_v0 }
  0x13   : > { %v280_v4 = vld [vmem:[%s256_s18 + $0x40] sm:$0xf] (%p35_p3)  ;;  %275 = vst [vmem:[%s254_s19 + $0x4] sm:$0xf] (%p35_p3), %v274_v1  ;;  %277 = vst [vmem:[%s254_s19 + $0x8] sm:$0xf] (%p35_p3), %v276_v2 }
  0x14   : > { %279 = vst [vmem:[%s254_s19 + $0xc] sm:$0xf] (%p35_p3), %v278_v3  ;;  %281 = vst [vmem:[%s254_s19 + $0x10] sm:$0xf] (%p35_p3), %v280_v4 }
  0x15 PF: > { %p633_p5 = scmp.ge.s32.totalorder %s743_s29, 1  ;;  %p313_p6 = scmp.lt.s32.totalorder %s743_s29, 5 }
  0x17   : > { %p314_p7 = pnand %p633_p5, %p313_p6 }
  0x18   : > { %s320_s20 = sand.u32 (!%p314_p7), 1, %s735_s27   ;;  %v745_v5 = vmov (!%p314_p7), 0.0   ;;  %v746_v6 = vmov (!%p314_p7), 0.0|0.0   ;;  %vm747_vm0 = vmmov (!%p314_p7), 0   ;;  %v363_v7 = vld [vmem:[%s885_s2] sm:$0xff] (!%p314_p7)  ;;  %v748_v9 = vmov (!%p314_p7), 0  }
  0x19   : > { %317 = sbr.rel (%p314_p7) target bundleno = 412 (0x19c), region = 81  ;;  %654 = vmatprep.subr.bf16.mxu0 (!%p314_p7), %v745_v5  ;;  %677 = vmatprep.subr.bf16.mxu1 (!%p314_p7), %v746_v6  ;;  %v526_v8 = vld [vmem:[%s888_s5] sm:$0xff] (!%p314_p7)  ;;  %vm388_vm2 = vcmask (!%p314_p7), 1041408   ;;  %vm384_vm3 = vcmask (!%p314_p7), 293888   ;;  %vm452_vm4 = vcmask (!%p314_p7), 1043456   ;;  %p352_p8 = scmp.lt.s32.totalorder (!%p314_p7), %s811_s30, 3 }
  0x1a   : > { %s684_s21 = smul.u32 (!%p314_p7), 20, %s320_s20  ;;  %660 = vmatprep.mubr.msk.bf16.mxu0 (!%p314_p7), %vm747_vm0, %v745_v5  ;;  %674 = vmatprep.mubr.msk.f32.mxu1 (!%p314_p7), %vm747_vm0, %v745_v5  ;;  %vm527_vm1 = vcmp.gt.f32.partialorder (!%p314_p7), %v526_v8, 0.5  ;;  %v443_v16 = vld [vmem:[%s887_s4] sm:$0xff] (!%p314_p7)  ;;  %p641_p9 = scmp.ne.s32.totalorder (!%p314_p7), %s811_s30, 0 }
  0x1b   : > { %714 = vset.pattern.permute.xlu0 (!%p314_p7), %v748_v9  ;;  %715 = vset.pattern.permute.xlu1 (!%p314_p7), %v748_v9  ;;  %v531_v12 = vsel (!%p314_p7), %vm527_vm1, 1, %v748_v9  ;;  %v362_v29 = vld [vmem:[%s884_s1] sm:$0xf] (!%p314_p7) }
  0x1c   : > { %s322_s26 = scalar_lea.vmem (!%p314_p7), [#allocation2], %s684_s21  ;;  %366 = vperm.xlu0 (!%p314_p7), %714, %v363_v7   ;;  %533 = vperm.xlu1 (!%p314_p7), %715, %v531_v12   ;;  %v437_v30 = vld [vmem:[%s886_s3] sm:$0xff] (!%p314_p7) }
  0x1d   : > { %v357_v10 = vld [vmem:[%s322_s26] sm:$0xff] (!%p314_p7)   ;;  %v359_v11 = vld [vmem:[%s322_s26 + $0x8] sm:$0xff] (!%p314_p7)   ;;  %v361_v15 = vld [vmem:[%s322_s26 + $0x10] sm:$0x3] (!%p314_p7) }
  0x1e   : > { %v432_v13 = vunpack.c.l.bf16 (!%p314_p7), %v357_v10  ;;  %v433_v14 = vunpack.c.h.bf16 (!%p314_p7), %v357_v10  ;;  %v434_v17 = vunpack.c.l.bf16 (!%p314_p7), %v359_v11  ;;  %v435_v18 = vunpack.c.h.bf16 (!%p314_p7), %v359_v11  ;;  %655 = vmatpush3.bf16.msra.mxu0 (!%p314_p7), %v357_v10 }
  0x1f   : > { %656 = vmatprep.subr.bf16.mxu0 (!%p314_p7), %v745_v5  ;;  %v637_v21 = vcombine.low (!%p314_p7), %v361_v15, %v361_v15  ;;  %v436_v25 = vunpack.c.l.bf16 (!%p314_p7), %v361_v15 }
  0x20   : > { %v438_v19 = vmul.f32 %v432_v13, %v432_v13  ;;  %v439_v20 = vmul.f32 %v433_v14, %v433_v14  ;;  %v440_v22 = vmul.f32 %v434_v17, %v434_v17  ;;  %v441_v23 = vmul.f32 %v435_v18, %v435_v18  ;;  %446 = vperm.xlu0 %714, %v443_v16   ;;  %s353_s15 = scalar_select %p352_p8, %s811_s30, 3 }
  0x21   : > { %v390_v27 = vsel %vm388_vm2, %v637_v21, 0  ;;  %v442_v28 = vmul.f32 %v436_v25, %v436_v25  ;;  %vm542_vm6 = vcmask (!%p641_p9), 7168   ;;  %v749_v45 = vmov (!%p641_p9), 0.0  }
  0x22   : > { %v678_v24 = vpack.c.bf16 %v439_v20, %v438_v19  ;;  %657 = vmatpush3.bf16.msra.mxu0 %v359_v11  ;;  %v681_v26 = vpack.c.bf16 %v441_v23, %v440_v22  ;;  %s634_s16 = sshll.u32 %s353_s15, 3  ;;  %543 = vst.msk [vmem:[%s890_s7] sm:$0xff] (!%p641_p9), %vm542_vm6, %v749_v45  ;;  %544 = vst.msk [vmem:[%s891_s8] sm:$0xff] (!%p641_p9), %vm542_vm6, %v749_v45 }
  0x23   : > { %658 = vmatprep.subr.bf16.mxu0 %v745_v5  ;;  %s355_s19 = scalar_lea.vmem %s889_s6, %s634_s16 }
  0x24   : > { %679 = vmatpush3.bf16.msra.mxu1 %v678_v24 }
  0x25   : > { %680 = vmatprep.subr.bf16.mxu1 %v746_v6 }
  0x26   : > { %659 = vmatpush3.bf16.msra.mxu0 %v390_v27 }
  0x28   : > { %682 = vmatpush3.bf16.msra.mxu1 %v681_v26 }
  0x29   : > { %672 = vmatprep.subr.mxu1 %v745_v5  ;;  %661 = vmatmul.mubr.msk.bf16.vlgmr.msra.gmra.mrb[0].mxu0 %vm384_vm3, %v362_v29 }
  0x2c   : > { %673 = vmatpush3.msk.msra.mxu1 %vm452_vm4, %v442_v28 }
  0x2d   : > { %675 = vmatmul.mubr.msk.f32.vlgmr.msra.gmra.mrb[0].mxu1 %vm384_vm3, %v437_v30 }
  0x9b   : > { %v367_v31 = vpop.permute.xlu0 %366  ;;  %v534_v33 = vpop.permute.xlu1 %533 }
  0x9c   : > { %vm535_vm5 = vcmp.eq.s32.totalorder %v534_v33, 1 }
  0x9f   : > { %v447_v34 = vpop.permute.xlu0 %446 }
  0xfc   : > { %v426_v32 = vpop.f32.mrb[0].mxu0 }
  0xfd   : > { %v427_v35 = vadd.f32 %v426_v32, %v367_v31  ;;  %v662_v36 = vpop.f32.mrb[1].mxu0 }
  0xfe   : > { %v429_v37 = vpop.f32.mrb[2].mxu0 }
  0xff   : > { %v528_v39 = vmul.f32 %v427_v35, %v427_v35  ;;  %v663_v41 = vpop.f32.mrb[3].mxu0 }
 0x100   : > { %v522_v38 = vpop.f32.mrb[0].mxu1  ;;  %541 = sbr.rel (%p641_p9) target bundleno = 263 (0x107), region = 89 }
 0x101   : > { %v523_v40 = vadd.f32 %v522_v38, %v447_v34  ;;  %v676_v42 = vpop.f32.mrb[1].mxu1 }
 0x103   : > { %v529_v43 = vsub.f32 %v528_v39, %v523_v40 }
 0x105   : > { %v536_v44 = vsel %vm535_vm5, %v427_v35, %v529_v43 }
 0x106   : > { %537 = vst [vmem:[%s355_s19] sm:$0xff] %v536_v44 }
 0x107 PF: > { %546 = vadd.xlane.f32.xlu0 %v536_v44  ;;  %v552_v46 = vmul.f32 %v536_v44, %v536_v44  ;;  %v545_v47 = vld [vmem:[%s890_s7] sm:$0xff]  ;;  %vm549_vm7 = vcmask 7168  }
 0x108   : > { %v551_v50 = vld [vmem:[%s891_s8] sm:$0xff] }
 0x10b   : > { %553 = vadd.xlane.f32.xlu0 %v552_v46 }
 0x194   : > { %v547_v48 = vpop.xlane.xlu0 %546 }
 0x195   : > { %v548_v49 = vadd.f32 %v547_v48, %v545_v47 }
 0x197   : > { %550 = vst.msk [vmem:[%s890_s7] sm:$0xff] %vm549_vm7, %v548_v49 }
 0x198   : > { %v554_v51 = vpop.xlane.xlu0 %553 }
 0x199   : > { %v555_v52 = vadd.f32 %v554_v51, %v551_v50 }
 0x19b   : > { %556 = vst.msk [vmem:[%s891_s8] sm:$0xff] %vm549_vm7, %v555_v52 }
 0x19c PF: > { %p16_p10 = scmp.ge.s32.totalorder %s814_s9, 6   ;;  %s892_s27 = smov %s739_s28 }
 0x19d   : > { %s893_s28 = smov %s823_s12  ;;  %s894_s29 = smov %s814_s9 }
 0x19e   :  { %18 = sbr.rel (!%p16_p10) target bundleno = 2 (0x2), region = 140 }

// kernel: split_resqu_conv.3
= control target key start
LH: loop header
LB: loop body
LE: loop exit
PB: predicated region body
PF: predicated region fallthrough
CT: control target
= control target key end

     0   :  { %s908_s15 = smov 0   ;;  %s910_s16 = smov 0   ;;  %s1130_s0 = inlined_call_operand.vmem [shape: f32[8,2,256], index: 0, kind: input, shape index: {}]   ;;  %s1131_s1 = inlined_call_operand.vmem [shape: f32[8,1,1], index: 1, kind: input, shape index: {}]   ;;  %s1132_s2 = inlined_call_operand.vmem [shape: f32[8,1,1], index: 2, kind: input, shape index: {}]   ;;  %s1133_s3 = inlined_call_operand.vmem [shape: f32[8,1,1], index: 3, kind: input, shape index: {}]   ;;  %s1134_s4 = inlined_call_operand.vmem [shape: f32[8,2,256], index: 4, kind: output, shape index: {}]  }
   0x1   :  { %s912_s17 = smov 0  }
   0x2 LB: > { %s786_s18 = sadd.s32 4294967295, %s880_s17   ;;  %s925_s19 = sadd.s32 1, %s880_s17   ;;  %s880_s17 = sphi %s912_s17, %s1138_s17   ;;  %s876_s16 = sphi %s910_s16, %s1137_s16   ;;  %s872_s15 = sphi %s908_s15, %s1136_s15  }
   0x3   : > { %s18_s20 = ssub.s32 %s880_s17, %s925_s19  ;;  %s21_s21 = sadd.s32 1, %s876_s16 }
   0x4   : > { %p19_p0 = scmp.eq.s32.totalorder %s18_s20, 0  ;;  %p28_p1 = scmp.ne.s32.totalorder %s876_s16, %s872_s15 }
   0x5   : > { %p29_p2 = scmp.eq.s32.totalorder %s880_s17, 0  ;;  %p121_p3 = scmp.eq.s32.totalorder %s786_s18, 1 }
   0x6   : > { %s936_s22 = scalar_select %p19_p0, %s876_s16, %s21_s21  }
   0x7   : > { %p30_p4 = por %p29_p2, %p28_p1  ;;  %p938_p5 = por %p121_p3, %p28_p1 }
   0x8   : > { %p789_p6 = scmp.ge.s32.totalorder %s880_s17, 2 }
   0xa   : > { %152 = sbr.rel (%p789_p6) target bundleno = 26 (0x1a), region = 28 }
  0x11   : > { %155 = sbr.rel (!%p30_p4) target bundleno = 26 (0x1a), region = 32  ;;  %s157_s24 = sand.u32 (%p30_p4), 1, %s876_s16  }
  0x12   : > { %s791_s25 = sshll.u32 (%p30_p4), %s880_s17, 1  ;;  %s790_s26 = sshll.u32 (%p30_p4), %s157_s24, 4 }
  0x13   : > { %s161_s29 = scalar_lea.vmem (%p30_p4), %s1130_s0, %s791_s25  ;;  %s159_s30 = scalar_lea.vmem (%p30_p4), [#allocation2], %s790_s26 }
  0x14   : > { %v177_v0 = vld [vmem:[%s161_s29] sm:$0x3] (%p30_p4)  ;;  %v179_v1 = vld [vmem:[%s161_s29 + $0x4] sm:$0x3] (%p30_p4)  ;;  %v181_v2 = vld [vmem:[%s161_s29 + $0x8] sm:$0x3] (%p30_p4) }
  0x15   : > { %178 = vst [vmem:[%s159_s30] sm:$0x3] (%p30_p4), %v177_v0  ;;  %180 = vst [vmem:[%s159_s30 + $0x2] sm:$0x3] (%p30_p4), %v179_v1  ;;  %v183_v3 = vld [vmem:[%s161_s29 + $0xc] sm:$0x3] (%p30_p4) }
  0x16   : > { %v185_v4 = vld [vmem:[%s161_s29 + $0x10] sm:$0x3] (%p30_p4)  ;;  %182 = vst [vmem:[%s159_s30 + $0x4] sm:$0x3] (%p30_p4), %v181_v2  ;;  %184 = vst [vmem:[%s159_s30 + $0x6] sm:$0x3] (%p30_p4), %v183_v3 }
  0x17   : > { %186 = vst [vmem:[%s159_s30 + $0x8] sm:$0x3] (%p30_p4), %v185_v4  ;;  %v187_v5 = vld [vmem:[%s161_s29 + $0x14] sm:$0x3] (%p30_p4)  ;;  %v189_v6 = vld [vmem:[%s161_s29 + $0x18] sm:$0x3] (%p30_p4) }
  0x18   : > { %v191_v7 = vld [vmem:[%s161_s29 + $0x1c] sm:$0x3]  ;;  %188 = vst [vmem:[%s159_s30 + $0xa] sm:$0x3] %v187_v5  ;;  %190 = vst [vmem:[%s159_s30 + $0xc] sm:$0x3] %v189_v6 }
  0x19   : > { %192 = vst [vmem:[%s159_s30 + $0xe] sm:$0x3] %v191_v7 }
  0x1a PF: > { %p792_p7 = scmp.ge.s32.totalorder %s880_s17, 1  ;;  %p230_p8 = scmp.lt.s32.totalorder %s880_s17, 3 }
  0x1c   : > { %p231_p9 = pnand %p792_p7, %p230_p8 }
  0x1d   : > { %v797_v8 = vld [vmem:[%s1131_s1 + $0x2] ss:$0 sm:$0xff] (!%p231_p9)  ;;  %v795_v9 = vld [vmem:[%s1131_s1] ss:$0 sm:$0xff] (!%p231_p9)  ;;  %v882_v10 = vmov (!%p231_p9), 0   ;;  %v550_v19 = vlaneseq (!%p231_p9)  ;;  %s237_s20 = sand.u32 (!%p231_p9), 1, %s872_s15  }
  0x1e   : > { %234 = sbr.rel (%p231_p9) target bundleno = 218 (0xda), region = 73  ;;  %841 = vset.pattern.permute.xlu1 (!%p231_p9), %v882_v10  ;;  %840 = vset.pattern.permute.xlu0 (!%p231_p9), %v882_v10  ;;  %v798_v11 = vld [vmem:[%s1131_s1 + $0x3] ss:$0 sm:$0xff] (!%p231_p9)  ;;  %v796_v12 = vld [vmem:[%s1131_s1 + $0x1] ss:$0 sm:$0xff] (!%p231_p9)  ;;  %s1033_s21 = sshll.u32 (!%p231_p9), %s237_s20, 4 }
  0x1f   : > { %326 = vperm.xlu1 (!%p231_p9), %841, %v797_v8   ;;  %318 = vperm.xlu0 (!%p231_p9), %840, %v795_v9   ;;  %v800_v13 = vld [vmem:[%s1131_s1 + $0x5] ss:$0 sm:$0xff] (!%p231_p9)  ;;  %v799_v14 = vld [vmem:[%s1131_s1 + $0x4] ss:$0 sm:$0xff] (!%p231_p9)  ;;  %v802_v15 = vld [vmem:[%s1131_s1 + $0x7] ss:$0 sm:$0xff] (!%p231_p9) }
  0x20   : > { %v801_v16 = vld [vmem:[%s1131_s1 + $0x6] ss:$0 sm:$0xff] (!%p231_p9)  ;;  %v804_v17 = vld [vmem:[%s1132_s2 + $0x1] ss:$0 sm:$0xff] (!%p231_p9)  ;;  %v803_v18 = vld [vmem:[%s1132_s2] ss:$0 sm:$0xff] (!%p231_p9) }
  0x21   : > { %v806_v20 = vld [vmem:[%s1132_s2 + $0x3] ss:$0 sm:$0xff] (!%p231_p9)  ;;  %v805_v21 = vld [vmem:[%s1132_s2 + $0x2] ss:$0 sm:$0xff] (!%p231_p9)  ;;  %v358_v22 = vld [vmem:[%s1133_s3 + $0x1] sm:$0x1] (!%p231_p9) }
  0x22   : > { %v357_v23 = vld [vmem:[%s1133_s3] sm:$0x1] (!%p231_p9)  ;;  %v551_v24 = vshrl.u32 (!%p231_p9), %v550_v19, 7  ;;  %v808_v25 = vld [vmem:[%s1132_s2 + $0x5] ss:$0 sm:$0xff] (!%p231_p9)  ;;  %vm366_vm0 = vcmp.gt.f32.partialorder (!%p231_p9), %v358_v22, 0.5 }
  0x23   : > { %330 = vperm.xlu1 (!%p231_p9), %841, %v798_v11   ;;  %322 = vperm.xlu0 (!%p231_p9), %840, %v796_v12   ;;  %v807_v26 = vld [vmem:[%s1132_s2 + $0x4] ss:$0 sm:$0xff] (!%p231_p9)  ;;  %vm365_vm1 = vcmp.gt.f32.partialorder (!%p231_p9), %v357_v23, 0.5  ;;  %v360_v27 = vld [vmem:[%s1133_s3 + $0x3] sm:$0x1] (!%p231_p9)  ;;  %v543_v32 = vsel (!%p231_p9), %vm366_vm0, 1, %v882_v10 }
  0x24   : > { %v359_v28 = vld [vmem:[%s1133_s3 + $0x2] sm:$0x1] (!%p231_p9)  ;;  %v552_v29 = vsub.s32 (!%p231_p9), 0, %v551_v24  ;;  %v810_v30 = vld [vmem:[%s1132_s2 + $0x7] ss:$0 sm:$0xff] (!%p231_p9)  ;;  %v542_v33 = vsel (!%p231_p9), %vm365_vm1, 1, %v882_v10 }
  0x25   : > { %v809_v31 = vld [vmem:[%s1132_s2 + $0x6] ss:$0 sm:$0xff]  ;;  %vm368_vm2 = vcmp.gt.f32.partialorder %v360_v27, 0.5  ;;  %vm367_vm3 = vcmp.gt.f32.partialorder %v359_v28, 0.5  ;;  %v362_v34 = vld [vmem:[%s1133_s3 + $0x5] sm:$0x1] }
  0x26   : > { %v361_v35 = vld [vmem:[%s1133_s3 + $0x4] sm:$0x1]  ;;  %v557_v36 = vrot.slane %v543_v32, %v552_v29  ;;  %v553_v37 = vrot.slane %v542_v33, %v552_v29  ;;  %v545_v38 = vsel %vm368_vm2, 1, %v882_v10  ;;  %v544_v39 = vsel %vm367_vm3, 1, %v882_v10  ;;  %v364_v40 = vld [vmem:[%s1133_s3 + $0x7] sm:$0x1] }
  0x27   : > { %338 = vperm.xlu1 %841, %v800_v13   ;;  %334 = vperm.xlu0 %840, %v799_v14   ;;  %vm370_vm4 = vcmp.gt.f32.partialorder %v362_v34, 0.5  ;;  %vm369_vm5 = vcmp.gt.f32.partialorder %v361_v35, 0.5  ;;  %v363_v41 = vld [vmem:[%s1133_s3 + $0x6] sm:$0x1]  ;;  %v565_v42 = vrot.slane %v545_v38, %v552_v29  ;;  %v561_v43 = vrot.slane %v544_v39, %v552_v29  ;;  %s1036_s24 = scalar_lea.vmem [#allocation2], %s1033_s21  ;;  %s1087_s15 = scalar_lea.vmem [#allocation3], %s1033_s21 }
  0x28   : > { %v547_v44 = vsel %vm370_vm4, 1, %v882_v10  ;;  %v546_v45 = vsel %vm369_vm5, 1, %v882_v10  ;;  %vm372_vm6 = vcmp.gt.f32.partialorder %v364_v40, 0.5  ;;  %vm371_vm7 = vcmp.gt.f32.partialorder %v363_v41, 0.5  ;;  %v263_v52 = vld [vmem:[%s1036_s24 + $0x4] sm:$0x3] }
  0x29   : > { %v573_v46 = vrot.slane %v547_v44, %v552_v29  ;;  %v569_v47 = vrot.slane %v546_v45, %v552_v29  ;;  %v549_v48 = vsel %vm372_vm6, 1, %v882_v10  ;;  %v548_v49 = vsel %vm371_vm7, 1, %v882_v10  ;;  %v261_v53 = vld [vmem:[%s1036_s24] sm:$0x3]  ;;  %v264_v58 = vld [vmem:[%s1036_s24 + $0x6] sm:$0x3] }
  0x2a   : > { %v581_v50 = vrot.slane %v549_v48, %v552_v29  ;;  %v577_v51 = vrot.slane %v548_v49, %v552_v29  ;;  %vm381_vm8 = vcmask 1041408   ;;  %v262_v59 = vld [vmem:[%s1036_s24 + $0x2] sm:$0x3]  ;;  %v266_v6 = vld [vmem:[%s1036_s24 + $0xa] sm:$0x3]  ;;  %s812_s25 = sshll.u32 (%p938_p5), %s786_s18, 1 }
  0x2b   : > { %346 = vperm.xlu1 %841, %v802_v15   ;;  %342 = vperm.xlu0 %840, %v801_v16   ;;  %v265_v7 = vld [vmem:[%s1036_s24 + $0x8] sm:$0x3]  ;;  %v267_v23 = vld [vmem:[%s1036_s24 + $0xc] sm:$0x3]  ;;  %s662_s28 = scalar_lea.vmem (%p938_p5), %s1134_s4, %s812_s25 }
  0x2f   : > { %507 = vperm.xlu1 %841, %v804_v17   ;;  %503 = vperm.xlu0 %840, %v803_v18   ;;  %v268_v18 = vld [vmem:[%s1036_s24 + $0xe] sm:$0x3] }
  0x33   : > { %515 = vperm.xlu1 %841, %v806_v20   ;;  %511 = vperm.xlu0 %840, %v805_v21  }
  0x37   : > { %523 = vperm.xlu1 %841, %v808_v25   ;;  %519 = vperm.xlu0 %840, %v807_v26  }
  0x3b   : > { %531 = vperm.xlu1 %841, %v810_v30   ;;  %527 = vperm.xlu0 %840, %v809_v31  }
  0x3f   : > { %586 = vperm.xlu1 %841, %v557_v36   ;;  %583 = vperm.xlu0 %840, %v553_v37  }
  0x43   : > { %592 = vperm.xlu1 %841, %v565_v42   ;;  %589 = vperm.xlu0 %840, %v561_v43  }
  0x47   : > { %598 = vperm.xlu1 %841, %v573_v46   ;;  %595 = vperm.xlu0 %840, %v569_v47  }
  0x4b   : > { %604 = vperm.xlu1 %841, %v581_v50   ;;  %601 = vperm.xlu0 %840, %v577_v51  }
  0x9e   : > { %v327_v54 = vpop.permute.xlu1 %326  ;;  %v319_v55 = vpop.permute.xlu0 %318 }
  0x9f   : > { %v1040_v56 = vsub.f32 %v263_v52, %v327_v54  ;;  %v1042_v57 = vsub.f32 %v261_v53, %v319_v55 }
  0xa1   : > { %v375_v60 = vand.u32 2147483647, %v1040_v56  ;;  %v373_v61 = vand.u32 2147483647, %v1042_v57 }
  0xa2   : > { %v331_v62 = vpop.permute.xlu1 %330  ;;  %v323_v63 = vpop.permute.xlu0 %322 }
  0xa3   : > { %v396_v0 = vsel %vm381_vm8, %v375_v60, -inf  ;;  %v382_v1 = vsel %vm381_vm8, %v373_v61, -inf  ;;  %v1050_v2 = vsub.f32 %v264_v58, %v331_v62  ;;  %v1052_v3 = vsub.f32 %v262_v59, %v323_v63 }
  0xa4   : > { %v397_v4 = vrot.slane %v396_v0, 4  ;;  %v383_v5 = vrot.slane %v382_v1, 4 }
  0xa5   : > { %v376_v8 = vand.u32 2147483647, %v1050_v2  ;;  %v374_v9 = vand.u32 2147483647, %v1052_v3 }
  0xa6   : > { %v398_v10 = vmax.f32 %v396_v0, %v397_v4  ;;  %v384_v11 = vmax.f32 %v382_v1, %v383_v5  ;;  %v339_v12 = vpop.permute.xlu1 %338  ;;  %v335_v13 = vpop.permute.xlu0 %334 }
  0xa7   : > { %v403_v14 = vsel %vm381_vm8, %v376_v8, -inf  ;;  %v389_v15 = vsel %vm381_vm8, %v374_v9, -inf  ;;  %v1060_v16 = vsub.f32 %v266_v6, %v339_v12  ;;  %v1062_v17 = vsub.f32 %v265_v7, %v335_v13 }
  0xa8   : > { %v399_v19 = vrot.slane %v398_v10, 2  ;;  %v385_v20 = vrot.slane %v384_v11, 2  ;;  %v404_v21 = vrot.slane %v403_v14, 4  ;;  %v390_v22 = vrot.slane %v389_v15, 4 }
  0xa9   : > { %v378_v24 = vand.u32 2147483647, %v1060_v16  ;;  %v377_v25 = vand.u32 2147483647, %v1062_v17 }
  0xaa   : > { %v400_v26 = vmax.f32 %v398_v10, %v399_v19  ;;  %v386_v27 = vmax.f32 %v384_v11, %v385_v20  ;;  %v405_v28 = vmax.f32 %v403_v14, %v404_v21  ;;  %v391_v29 = vmax.f32 %v389_v15, %v390_v22  ;;  %v347_v30 = vpop.permute.xlu1 %346  ;;  %v343_v31 = vpop.permute.xlu0 %342 }
  0xab   : > { %v417_v32 = vsel %vm381_vm8, %v378_v24, -inf  ;;  %v410_v33 = vsel %vm381_vm8, %v377_v25, -inf  ;;  %v1070_v34 = vsub.f32 %v268_v18, %v347_v30  ;;  %v1072_v35 = vsub.f32 %v267_v23, %v343_v31 }
  0xac   : > { %v387_v36 = vrot.slane %v386_v27, 1  ;;  %v406_v37 = vrot.slane %v405_v28, 2  ;;  %v392_v38 = vrot.slane %v391_v29, 2  ;;  %v418_v39 = vrot.slane %v417_v32, 4 }
  0xad   : > { %v411_v40 = vrot.slane %v410_v33, 4  ;;  %v380_v41 = vand.u32 2147483647, %v1070_v34  ;;  %v379_v42 = vand.u32 2147483647, %v1072_v35  ;;  %v401_v43 = vrot.slane %v400_v26, 1 }
  0xae   : > { %v388_v44 = vmax.f32 %v386_v27, %v387_v36  ;;  %v407_v45 = vmax.f32 %v405_v28, %v406_v37  ;;  %v393_v46 = vmax.f32 %v391_v29, %v392_v38  ;;  %v508_v47 = vpop.permute.xlu1 %507  ;;  %v504_v48 = vpop.permute.xlu0 %503  ;;  %v419_v49 = vmax.f32 %v417_v32, %v418_v39 }
  0xaf   : > { %v412_v50 = vmax.f32 %v410_v33, %v411_v40  ;;  %v431_v51 = vsel %vm381_vm8, %v380_v41, -inf  ;;  %v424_v52 = vsel %vm381_vm8, %v379_v42, -inf  ;;  %v402_v4 = vmax.f32 %v400_v26, %v401_v43 }
  0xb0   : > { %v408_v53 = vrot.slane %v407_v45, 1  ;;  %v394_v54 = vrot.slane %v393_v46, 1  ;;  %v432_v55 = vrot.slane %v431_v51, 4  ;;  %842 = vrcp.f32 %v388_v44 }
  0xb1   : > { %v420_v58 = vrot.slane %v419_v49, 2  ;;  %v413_v59 = vrot.slane %v412_v50, 2  ;;  %v425_v60 = vrot.slane %v424_v52, 4  ;;  %v534_v29 = vmul.f32 %v504_v48, %v1042_v57 }
  0xb2   : > { %v409_v61 = vmax.f32 %v407_v45, %v408_v53  ;;  %v395_v62 = vmax.f32 %v393_v46, %v394_v54  ;;  %v433_v63 = vmax.f32 %v431_v51, %v432_v55  ;;  %v516_v0 = vpop.permute.xlu1 %515  ;;  %v512_v1 = vpop.permute.xlu0 %511  ;;  %v535_v36 = vmul.f32 %v508_v47, %v1052_v3 }
  0xb3   : > { %v421_v5 = vmax.f32 %v419_v49, %v420_v58  ;;  %v414_v6 = vmax.f32 %v412_v50, %v413_v59  ;;  %v426_v7 = vmax.f32 %v424_v52, %v425_v60  ;;  %v537_v41 = vmul.f32 %v516_v0, %v1050_v2 }
  0xb4   : > { %844 = vrcp.f32 %v409_v61  ;;  %v434_v8 = vrot.slane %v433_v63, 2  ;;  %v536_v47 = vmul.f32 %v512_v1, %v1040_v56 }
  0xb5   : > { %846 = vrcp.f32 %v395_v62  ;;  %v422_v9 = vrot.slane %v421_v5, 1  ;;  %v415_v10 = vrot.slane %v414_v6, 1  ;;  %v427_v11 = vrot.slane %v426_v7, 2 }
  0xb6   : > { %v435_v12 = vmax.f32 %v433_v63, %v434_v8  ;;  %v524_v13 = vpop.permute.xlu1 %523  ;;  %v520_v14 = vpop.permute.xlu0 %519  ;;  %848 = vrcp.f32 %v402_v4 }
  0xb7   : > { %v423_v15 = vmax.f32 %v421_v5, %v422_v9  ;;  %v416_v18 = vmax.f32 %v414_v6, %v415_v10  ;;  %v428_v19 = vmax.f32 %v426_v7, %v427_v11  ;;  %v538_v54 = vmul.f32 %v520_v14, %v1062_v17 }
  0xb8   : > { %v436_v20 = vrot.slane %v435_v12, 1 }
  0xb9   : > { %850 = vrcp.f32 %v423_v15  ;;  %v429_v21 = vrot.slane %v428_v19, 1 }
  0xba   : > { %852 = vrcp.f32 %v416_v18  ;;  %v437_v22 = vmax.f32 %v435_v12, %v436_v20  ;;  %v532_v23 = vpop.permute.xlu1 %531  ;;  %v528_v24 = vpop.permute.xlu0 %527 }
  0xbb   : > { %v843_v25 = vpop.eup %842  ;;  %v430_v26 = vmax.f32 %v428_v19, %v429_v21  ;;  %v540_v1 = vmul.f32 %v528_v24, %v1072_v35 }
  0xbc   : > { %854 = vrcp.f32 %v437_v22  ;;  %v439_v28 = vmul.f32 %v843_v25, %v1042_v57 }
  0xbd   : > { %856 = vrcp.f32 %v430_v26 }
  0xbe   : > { %v845_v27 = vpop.eup %844  ;;  %v587_v30 = vpop.permute.xlu1 %586 }
  0xbf   : > { %v584_v31 = vpop.permute.xlu0 %583  ;;  %v847_v32 = vpop.eup %846  ;;  %vm607_vm9 = vcmp.eq.s32.totalorder %v587_v30, 1  ;;  %v445_v40 = vmul.f32 %v845_v27, %v1050_v2  ;;  %v539_v2 = vmul.f32 %v524_v13, %v1060_v16 }
  0xc0   : > { %vm606_vm10 = vcmp.eq.s32.totalorder %v584_v31, 1  ;;  %v441_v33 = vmul.f32 %v847_v32, %v1052_v3  ;;  %v849_v38 = vpop.eup %848 }
  0xc1   : > { %v614_v37 = vsel %vm606_vm10, %v534_v29, %v439_v28  ;;  %v443_v3 = vmul.f32 %v849_v38, %v1040_v56  ;;  %v541_v56 = vmul.f32 %v532_v23, %v1070_v34 }
  0xc2   : > { %vm622_vm11 = vcmp.ge.f32.partialorder %v614_v37, 0.0  ;;  %v630_v39 = vmul.f32 0.02, %v614_v37  ;;  %v615_v42 = vsel %vm607_vm9, %v535_v36, %v441_v33  ;;  %v593_v57 = vpop.permute.xlu1 %592 }
  0xc3   : > { %v590_v43 = vpop.permute.xlu0 %589  ;;  %v851_v44 = vpop.eup %850  ;;  %vm623_vm12 = vcmp.ge.f32.partialorder %v615_v42, 0.0  ;;  %v631_v45 = vmul.f32 0.02, %v615_v42  ;;  %vm609_vm13 = vcmp.eq.s32.totalorder %v593_v57, 1 }
  0xc4   : > { %v638_v46 = vsel %vm622_vm11, %v614_v37, %v630_v39  ;;  %v853_v48 = vpop.eup %852  ;;  %v617_v49 = vsel %vm609_vm13, %v537_v41, %v445_v40  ;;  %vm608_vm14 = vcmp.eq.s32.totalorder %v590_v43, 1  ;;  %v449_v53 = vmul.f32 %v851_v44, %v1060_v16 }
  0xc5   : > { %646 = vst [vmem:[%s1087_s15] sm:$0x3] %v638_v46  ;;  %v639_v50 = vsel %vm623_vm12, %v615_v42, %v631_v45  ;;  %vm625_vm15 = vcmp.ge.f32.partialorder %v617_v49, 0.0  ;;  %v633_v51 = vmul.f32 0.02, %v617_v49  ;;  %v616_v55 = vsel %vm608_vm14, %v536_v47, %v443_v3 }
  0xc6   : > { %v855_v52 = vpop.eup %854  ;;  %647 = vst [vmem:[%s1087_s15 + $0x2] sm:$0x3] %v639_v50  ;;  %v599_v58 = vpop.permute.xlu1 %598  ;;  %v447_v61 = vmul.f32 %v853_v48, %v1062_v17  ;;  %vm624_vm0 = vcmp.ge.f32.partialorder %v616_v55, 0.0  ;;  %v632_v63 = vmul.f32 0.02, %v616_v55 }
  0xc7   : > { %v596_v59 = vpop.permute.xlu0 %595  ;;  %v857_v60 = vpop.eup %856  ;;  %v641_v62 = vsel %vm625_vm15, %v617_v49, %v633_v51  ;;  %v453_v0 = vmul.f32 %v855_v52, %v1070_v34  ;;  %vm611_vm1 = vcmp.eq.s32.totalorder %v599_v58, 1 }
  0xc8   : > { %649 = vst [vmem:[%s1087_s15 + $0x6] sm:$0x3] %v641_v62  ;;  %vm610_vm2 = vcmp.eq.s32.totalorder %v596_v59, 1  ;;  %v451_v16 = vmul.f32 %v857_v60, %v1072_v35  ;;  %v640_v4 = vsel %vm624_vm0, %v616_v55, %v632_v63  ;;  %v619_v5 = vsel %vm611_vm1, %v539_v2, %v449_v53 }
  0xc9   : > { %v618_v6 = vsel %vm610_vm2, %v538_v54, %v447_v61  ;;  %648 = vst [vmem:[%s1087_s15 + $0x4] sm:$0x3] %v640_v4  ;;  %vm627_vm3 = vcmp.ge.f32.partialorder %v619_v5, 0.0  ;;  %v635_v17 = vmul.f32 0.02, %v619_v5 }
  0xca   : > { %vm626_vm4 = vcmp.ge.f32.partialorder %v618_v6, 0.0  ;;  %v634_v7 = vmul.f32 0.02, %v618_v6  ;;  %v605_v8 = vpop.permute.xlu1 %604 }
  0xcb   : > { %v602_v34 = vpop.permute.xlu0 %601  ;;  %vm613_vm5 = vcmp.eq.s32.totalorder %v605_v8, 1  ;;  %v643_v9 = vsel %vm627_vm3, %v619_v5, %v635_v17  ;;  %660 = sbr.rel (!%p938_p5) target bundleno = 218 (0xda), region = 81 }
  0xcc   : > { %vm612_vm6 = vcmp.eq.s32.totalorder %v602_v34, 1  ;;  %v642_v10 = vsel %vm626_vm4, %v618_v6, %v634_v7  ;;  %v621_v11 = vsel %vm613_vm5, %v541_v56, %v453_v0  ;;  %651 = vst [vmem:[%s1087_s15 + $0xa] sm:$0x3] %v643_v9  ;;  %v678_v18 = vld [vmem:[%s1087_s15] sm:$0x3] (%p938_p5) }
  0xcd   : > { %v620_v35 = vsel %vm612_vm6, %v540_v1, %v451_v16  ;;  %650 = vst [vmem:[%s1087_s15 + $0x8] sm:$0x3] %v642_v10  ;;  %vm629_vm7 = vcmp.ge.f32.partialorder %v621_v11, 0.0  ;;  %v637_v12 = vmul.f32 0.02, %v621_v11  ;;  %679 = vst [vmem:[%s662_s28] sm:$0x3] (%p938_p5), %v678_v18 }
  0xce   : > { %vm628_vm8 = vcmp.ge.f32.partialorder %v620_v35, 0.0  ;;  %v636_v13 = vmul.f32 0.02, %v620_v35  ;;  %v680_v19 = vld [vmem:[%s1087_s15 + $0x2] sm:$0x3] (%p938_p5) }
  0xcf   : > { %v645_v14 = vsel %vm629_vm7, %v621_v11, %v637_v12  ;;  %v684_v21 = vld [vmem:[%s1087_s15 + $0x6] sm:$0x3] (%p938_p5)  ;;  %681 = vst [vmem:[%s662_s28 + $0x4] sm:$0x3] (%p938_p5), %v680_v19 }
  0xd0   : > { %v644_v15 = vsel %vm628_vm8, %v620_v35, %v636_v13  ;;  %653 = vst [vmem:[%s1087_s15 + $0xe] sm:$0x3] %v645_v14  ;;  %v682_v20 = vld [vmem:[%s1087_s15 + $0x4] sm:$0x3] (%p938_p5)  ;;  %685 = vst [vmem:[%s662_s28 + $0xc] sm:$0x3] (%p938_p5), %v684_v21 }
  0xd1   : > { %652 = vst [vmem:[%s1087_s15 + $0xc] sm:$0x3] %v644_v15  ;;  %683 = vst [vmem:[%s662_s28 + $0x8] sm:$0x3] (%p938_p5), %v682_v20 }
  0xd3   : > { %v688_v23 = vld [vmem:[%s1087_s15 + $0xa] sm:$0x3] }
  0xd4   : > { %v686_v22 = vld [vmem:[%s1087_s15 + $0x8] sm:$0x3]  ;;  %689 = vst [vmem:[%s662_s28 + $0x14] sm:$0x3] %v688_v23 }
  0xd5   : > { %687 = vst [vmem:[%s662_s28 + $0x10] sm:$0x3] %v686_v22 }
  0xd7   : > { %v692_v25 = vld [vmem:[%s1087_s15 + $0xe] sm:$0x3] }
  0xd8   : > { %v690_v24 = vld [vmem:[%s1087_s15 + $0xc] sm:$0x3]  ;;  %693 = vst [vmem:[%s662_s28 + $0x1c] sm:$0x3] %v692_v25 }
  0xd9   : > { %691 = vst [vmem:[%s662_s28 + $0x18] sm:$0x3] %v690_v24 }
  0xda PF: > { %p11_p10 = scmp.ge.s32.totalorder %s925_s19, 4   ;;  %s1136_s15 = smov %s876_s16 }
  0xdb   : > { %s1137_s16 = smov %s936_s22  ;;  %s1138_s17 = smov %s925_s19 }
  0xdc   :  { %13 = sbr.rel (!%p11_p10) target bundleno = 2 (0x2), region = 153 }

</bundles_post_ra>
